<compile_context>
chip_gen: v5e
topology: v5e:2x2
jax: 0.10.0
libtpu: 0.0.40
codegen_flags: <defaults>
</compile_context>

<pallas_src>
import functools

import jax
import jax.numpy as jnp
from jax.experimental import pallas as pl
from jax.experimental.pallas import tpu as pltpu


# --------------------------------------------------------------------------
# Kernel body
# --------------------------------------------------------------------------
def basic_nn_kernel(params_ref, x_ref, o_ref, *, compute_dtype):
    # params_ref lives in SMEM: [w00, b00, w01, w10, b10, w11, final_bias]
    w00 = params_ref[0].astype(compute_dtype)
    b00 = params_ref[1].astype(compute_dtype)
    w01 = params_ref[2].astype(compute_dtype)
    w10 = params_ref[3].astype(compute_dtype)
    b10 = params_ref[4].astype(compute_dtype)
    w11 = params_ref[5].astype(compute_dtype)
    final_bias = params_ref[6].astype(compute_dtype)

    x = x_ref[...].astype(compute_dtype)
    h0 = jnp.maximum(x * w00 + b00, 0.0)                       # relu(x*w00 + b00)
    h1 = jnp.maximum(x * w10 + b10, 0.0)                       # relu(x*w10 + b10)
    y = jnp.maximum(w01 * h0 + w11 * h1 + final_bias, 0.0)     # final relu
    o_ref[...] = y.astype(o_ref.dtype)


# --------------------------------------------------------------------------
# Wrapper
# --------------------------------------------------------------------------
def _is_v5():
    # Best-effort generation check: v5 parts have no bf16 VPU -> compute in f32.
    try:
        return "v5" in jax.devices()[0].device_kind.lower()
    except Exception:
        return False


def _default_compute_dtype(dtype):
    if dtype == jnp.bfloat16 and not _is_v5():
        return jnp.bfloat16
    return jnp.float32


def basic_nn_forward(x, params, *, target_block_bytes=4 * 1024 * 1024,
                     compute_dtype=None):
    """Elementwise BasicNN forward for any input shape (f32 or bf16)."""
    orig_shape = x.shape
    n = x.size
    assert n > 0

    itemsize = x.dtype.itemsize
    row_align = 16 if itemsize <= 2 else 8
    if compute_dtype is None:
        compute_dtype = _default_compute_dtype(x.dtype)

    # --- lane-dense 2D layout; avoid any pad copy when n % 128 == 0 ---------
    lanes = None
    for cand in (512, 256, 128):
        if n % cand == 0:
            lanes = cand
            break
    xf = x.reshape(-1)
    if lanes is None:
        lanes = 512
        xf = jnp.pad(xf, (0, (-n) % lanes))  # only the tail remainder (< 512 elems)
    rows = xf.shape[0] // lanes
    x2 = xf.reshape(rows, lanes)

    # --- tile rows: target ~target_block_bytes per input block --------------
    cap = (target_block_bytes // (lanes * itemsize)) // row_align * row_align
    cap = max(cap, row_align)
    if rows <= cap:
        # One block spans the full row dim (legal even if not 8-aligned).
        tile_rows = rows
        total_bytes = rows * lanes * itemsize
        if total_bytes > (1 << 20) and rows >= 2 * row_align:
            # Split into >=2 grid steps so both v7x TensorCores get work.
            half = -(-rows // 2)
            tile_rows = -(-half // row_align) * row_align
    else:
        tile_rows = cap
    grid = (-(-rows // tile_rows),)  # cdiv; last block ragged -> masked stores

    cost = pl.CostEstimate(
        flops=11 * rows * lanes,
        transcendentals=0,
        bytes_accessed=2 * rows * lanes * itemsize + params.size * params.dtype.itemsize,
    )

    kernel = functools.partial(basic_nn_kernel, compute_dtype=compute_dtype)

    out2 = pl.pallas_call(
        kernel,
        out_shape=jax.ShapeDtypeStruct((rows, lanes), x.dtype),
        grid=grid,
        in_specs=[
            pl.BlockSpec(memory_space=pltpu.MemorySpace.SMEM),   # 7 scalar params
            pl.BlockSpec((tile_rows, lanes), lambda i: (i, 0)),
        ],
        out_specs=pl.BlockSpec((tile_rows, lanes), lambda i: (i, 0)),
        compiler_params=pltpu.CompilerParams(
            dimension_semantics=("parallel",),
            # Double-buffered in+out at 4 MiB blocks = 16 MiB; headroom but
            # still well under v7x's 64 MiB physical VMEM per TC.
            vmem_limit_bytes=40 * 1024 * 1024,
        ),
        cost_estimate=cost,
    )(params, x2)

    # The [:n] slice is what guarantees correctness for any padded elements.
    return out2.reshape(-1)[:n].reshape(orig_shape)


# --------------------------------------------------------------------------
# Pure-JAX reference
# --------------------------------------------------------------------------
def basic_nn_ref(x, params, compute_dtype=jnp.float32):
    p = params.astype(compute_dtype)
    w00, b00, w01, w10, b10, w11, final_bias = [p[i] for i in range(7)]
    xf = x.astype(compute_dtype)
    h0 = jnp.maximum(xf * w00 + b00, 0.0)
    h1 = jnp.maximum(xf * w10 + b10, 0.0)
    y = jnp.maximum(w01 * h0 + w11 * h1 + final_bias, 0.0)
    return y.astype(x.dtype)


if __name__ == "__main__":
    # Deterministic parameters from the module's __init__.
    params = jnp.array([1.7, -0.85, -40.8, 12.6, 0.0, 2.7, -16.0],
                       dtype=jnp.float32)

    key = jax.random.PRNGKey(0)
    k1, k2, k3, k4 = jax.random.split(key, 4)

    # 1) Main small test ("doses" in [0, 1)) — single full block, no padding.
    x = jax.random.uniform(k1, (16, 128), dtype=jnp.float32)
    out = jax.block_until_ready(basic_nn_forward(x, params))
    ref = basic_nn_ref(x, params)
    assert out.shape == x.shape and out.dtype == x.dtype
    assert jnp.allclose(out, ref, atol=1e-5, rtol=1e-5)

    # 2) Ragged-size test — exercises the tail-pad + [:n] unpad path.
    x2 = jax.random.uniform(k2, (3, 5, 7), dtype=jnp.float32)
    out2 = jax.block_until_ready(basic_nn_forward(x2, params))
    assert out2.shape == x2.shape
    assert jnp.allclose(out2, basic_nn_ref(x2, params), atol=1e-5, rtol=1e-5)

    # 3) Larger test — >1 MiB slab, multi-step grid with a ragged last block
    #    (no row padding; Pallas masks the final store).
    x3 = jax.random.uniform(k3, (1000, 640), dtype=jnp.float32)
    out3 = jax.block_until_ready(basic_nn_forward(x3, params))
    assert jnp.allclose(out3, basic_nn_ref(x3, params), atol=1e-5, rtol=1e-5)

    # 4) bf16 smoke test — bf16 compute path on v6e/v7x, f32 upcast on v5x.
    x4 = jax.random.uniform(k4, (64, 96), dtype=jnp.float32).astype(jnp.bfloat16)
    out4 = jax.block_until_ready(basic_nn_forward(x4, params))
    ref4 = basic_nn_ref(x4, params, _default_compute_dtype(x4.dtype))
    assert out4.dtype == jnp.bfloat16
    assert jnp.allclose(out4.astype(jnp.float32), ref4.astype(jnp.float32),
                        atol=0.3, rtol=0.05)

    print("KERNEL_OK")
</pallas_src>

<mosaic_0001>
module attributes {stable_mosaic.version = 11 : i64} {
  func.func @basic_nn_kernel(%arg0: i32, %arg1: memref<7xf32, #tpu.memory_space<smem>>, %arg2: memref<4x512xf32, #tpu.memory_space<vmem>>, %arg3: memref<4x512xf32, #tpu.memory_space<vmem>>) attributes {dimension_semantics = [#tpu.dimension_semantics<parallel>], iteration_bounds = array<i64: 1>, scalar_prefetch = 0 : i64, scratch_operands = 0 : i64, tpu.core_type = #tpu.core_type<tc>, window_params = [{transform_indices = @transform_0, window_bounds = array<i64: 7>}, {transform_indices = @transform_1, window_bounds = array<i64: 4, 512>}, {transform_indices = @transform_2, window_bounds = array<i64: 4, 512>}]} {
    %c0 = arith.constant 0 : index
    %0 = memref.load %arg1[%c0] : memref<7xf32, #tpu.memory_space<smem>>
    %c1 = arith.constant 1 : index
    %1 = memref.load %arg1[%c1] : memref<7xf32, #tpu.memory_space<smem>>
    %c2 = arith.constant 2 : index
    %2 = memref.load %arg1[%c2] : memref<7xf32, #tpu.memory_space<smem>>
    %c3 = arith.constant 3 : index
    %3 = memref.load %arg1[%c3] : memref<7xf32, #tpu.memory_space<smem>>
    %c4 = arith.constant 4 : index
    %4 = memref.load %arg1[%c4] : memref<7xf32, #tpu.memory_space<smem>>
    %c5 = arith.constant 5 : index
    %5 = memref.load %arg1[%c5] : memref<7xf32, #tpu.memory_space<smem>>
    %c6 = arith.constant 6 : index
    %6 = memref.load %arg1[%c6] : memref<7xf32, #tpu.memory_space<smem>>
    %c0_0 = arith.constant 0 : index
    %c0_1 = arith.constant 0 : index
    %7 = vector.load %arg2[%c0_0, %c0_1] : memref<4x512xf32, #tpu.memory_space<vmem>>, vector<4x512xf32>
    %8 = vector.broadcast %0 : f32 to vector<4x512xf32>
    %9 = arith.mulf %7, %8 : vector<4x512xf32>
    %10 = vector.broadcast %1 : f32 to vector<4x512xf32>
    %11 = arith.addf %9, %10 : vector<4x512xf32>
    %cst = arith.constant 0.000000e+00 : f32
    %12 = vector.broadcast %cst : f32 to vector<4x512xf32>
    %13 = arith.maximumf %11, %12 : vector<4x512xf32>
    %14 = vector.broadcast %3 : f32 to vector<4x512xf32>
    %15 = arith.mulf %7, %14 : vector<4x512xf32>
    %16 = vector.broadcast %4 : f32 to vector<4x512xf32>
    %17 = arith.addf %15, %16 : vector<4x512xf32>
    %cst_2 = arith.constant 0.000000e+00 : f32
    %18 = vector.broadcast %cst_2 : f32 to vector<4x512xf32>
    %19 = arith.maximumf %17, %18 : vector<4x512xf32>
    %20 = vector.broadcast %2 : f32 to vector<4x512xf32>
    %21 = arith.mulf %20, %13 : vector<4x512xf32>
    %22 = vector.broadcast %5 : f32 to vector<4x512xf32>
    %23 = arith.mulf %22, %19 : vector<4x512xf32>
    %24 = arith.addf %21, %23 : vector<4x512xf32>
    %25 = vector.broadcast %6 : f32 to vector<4x512xf32>
    %26 = arith.addf %24, %25 : vector<4x512xf32>
    %cst_3 = arith.constant 0.000000e+00 : f32
    %27 = vector.broadcast %cst_3 : f32 to vector<4x512xf32>
    %28 = arith.maximumf %26, %27 : vector<4x512xf32>
    %c0_4 = arith.constant 0 : index
    %c0_5 = arith.constant 0 : index
    %29 = vector.load %arg3[%c0_4, %c0_5] : memref<4x512xf32, #tpu.memory_space<vmem>>, vector<4x512xf32>
    tpu.vector_store %arg3[%c0_4, %c0_5], %28 {strides = array<i32>} : memref<4x512xf32, #tpu.memory_space<vmem>>, vector<4x512xf32>,
    return
  }
  func.func @transform_0(%arg0: i32) -> i32 {
    %c0_i32 = arith.constant 0 : i32
    %c0_i32_0 = arith.constant 0 : i32
    return %c0_i32 : i32
  }
  func.func @transform_1(%arg0: i32) -> (i32, i32) {
    %c0_i32 = arith.constant 0 : i32
    %c0_i32_0 = arith.constant 0 : i32
    return %arg0, %c0_i32 : i32, i32
  }
  func.func @transform_2(%arg0: i32) -> (i32, i32) {
    %c0_i32 = arith.constant 0 : i32
    %c0_i32_0 = arith.constant 0 : i32
    return %arg0, %c0_i32 : i32, i32
  }
}

</mosaic_0001>

<bundles_post_ra>
// kernel: tpu_custom_call.1
= control target key start
LH: loop header
LB: loop body
LE: loop exit
PB: predicated region body
PF: predicated region fallthrough
CT: control target
= control target key end

     0   :  { %7 = vsyncpa [#allocation5], 0  ;;  %s199_s0 = inlined_call_operand.hbm [shape: f32[7], index: 0, kind: input, shape index: {}]   ;;  %s200_s1 = inlined_call_operand.hbm [shape: f32[4,512], index: 1, kind: input, shape index: {}]   ;;  %s201_s2 = inlined_call_operand.hbm [shape: f32[4,512], index: 2, kind: output, shape index: {}]  }
   0x1   :  { %8 = vsyncpa [#allocation3], 0 }
   0x2   :  { %9 = vsyncpa [#allocation4], 0  ;;  %s15_s11 = sshll.u32 %s199_s0, 4  ;;  %s24_s14 = sshll.u32 %s200_s1, 4  ;;  %s16_s11 = int_to_ptr.hbm [resolvable:$true] %s15_s11  ;;  %s25_s14 = int_to_ptr.hbm [resolvable:$true] %s24_s14 }
   0x3   :  { %s172_s15 = smov [#allocation2]   ;;  %s173_s16 = smov [#allocation6]  }
   0x4   :  { %18 = dma.hbm_to_smem %s16_s11, 16, %s172_s15, [#allocation5]  }
   0x5   :  { %s26_s17 = sshll.u32 %s173_s16, 4  ;;  %s27_s17 = int_to_ptr.vmem [resolvable:$true] %s26_s17 }
   0x6   :  { %29 = dma.hbm_to_vmem [thread:$0]  %s25_s14, 256, %s27_s17, [#allocation3]  }
   0x7   :  { %166 = dma.done.wait [#allocation5], 16  }
   0x8   :  { %167 = vsyncadd [#allocation5], 4294967280 }
   0x9   :  { %168 = dma.done.wait [#allocation3], 256  }
   0xa   :  { %169 = vsyncadd [#allocation3], 4294967040 }
   0xb   :  { %38 = sfence }
   0xc   :  { %s39_s18 = sld [smem:[#allocation2]]  ;;  %v46_v0 = vld [vmem:[#allocation6] sm:$0xff]  ;;  %v47_v1 = vld [vmem:[#allocation6 + $0x8] sm:$0xff]  ;;  %s174_s23 = smov [#allocation7]  }
   0xd   :  { %s97_s19 = sld [smem:[#allocation2 + $0x1]]  ;;  %s84_s24 = sshll.u32 %s174_s23, 4  ;;  %s85_s24 = int_to_ptr.vmem [resolvable:$true] %s84_s24 }
   0xe   :  { %s98_s0 = sld [smem:[#allocation2 + $0x2]]  ;;  %s86_s27 = sshll.u32 %s201_s2, 4  ;;  %s87_s27 = int_to_ptr.hbm [resolvable:$true] %s86_s27 }
   0xf   :  { %s99_s20 = sld [smem:[#allocation2 + $0x3]] }
  0x10   :  { %s100_s21 = sld [smem:[#allocation2 + $0x4]] }
  0x11   :  { %s101_s1 = sld [smem:[#allocation2 + $0x5]] }
  0x12   :  { %v48_v2 = vstv %s39_s18  ;;  %s102_s22 = sld [smem:[#allocation2 + $0x6]] }
  0x13   :  { %v49_v3 = vmul.f32 %v48_v2, %v46_v0  ;;  %v51_v4 = vstv %s97_s19  ;;  %v50_v5 = vmul.f32 %v48_v2, %v47_v1 }
  0x14   :  { %v64_v13 = vstv %s98_s0 }
  0x15   :  { %v52_v6 = vadd.f32 %v51_v4, %v49_v3  ;;  %v56_v7 = vstv %s99_s20  ;;  %v53_v8 = vadd.f32 %v51_v4, %v50_v5 }
  0x16   :  { %v57_v9 = vmul.f32 %v56_v7, %v46_v0  ;;  %v59_v10 = vstv %s100_s21  ;;  %v58_v11 = vmul.f32 %v56_v7, %v47_v1 }
  0x17   :  { %v54_v12 = vmax.f32 %v52_v6, 0.0  ;;  %v55_v14 = vmax.f32 %v53_v8, 0.0  ;;  %v67_v17 = vstv %s101_s1 }
  0x18   :  { %v60_v15 = vadd.f32 %v59_v10, %v57_v9  ;;  %v61_v16 = vadd.f32 %v59_v10, %v58_v11  ;;  %v72_v24 = vstv %s102_s22 }
  0x19   :  { %v65_v19 = vmul.f32 %v64_v13, %v54_v12  ;;  %v66_v21 = vmul.f32 %v64_v13, %v55_v14 }
  0x1a   :  { %v62_v18 = vmax.f32 %v60_v15, 0.0  ;;  %v63_v20 = vmax.f32 %v61_v16, 0.0 }
  0x1c   :  { %v68_v22 = vmul.f32 %v67_v17, %v62_v18  ;;  %v69_v23 = vmul.f32 %v67_v17, %v63_v20 }
  0x1e   :  { %v70_v25 = vadd.f32 %v68_v22, %v65_v19  ;;  %v71_v26 = vadd.f32 %v69_v23, %v66_v21 }
  0x20   :  { %v73_v27 = vadd.f32 %v72_v24, %v70_v25  ;;  %v74_v28 = vadd.f32 %v72_v24, %v71_v26 }
  0x22   :  { %v75_v29 = vmax.f32 %v73_v27, 0.0  ;;  %v76_v30 = vmax.f32 %v74_v28, 0.0 }
  0x24   :  { %77 = vst [vmem:[#allocation7] sm:$0xff] %v75_v29 }
  0x25   :  { %78 = vst [vmem:[#allocation7 + $0x8] sm:$0xff] %v76_v30 }
  0x26   :  { %89 = dma.vmem_to_hbm [thread:$0]  %s85_s24, 256, %s87_s27, [#allocation4]  }
  0x27   :  { %170 = dma.done.wait [#allocation4], 256  }
  0x28   :  { %171 = vsyncadd [#allocation4], 4294967040 }
  0x29   :  { %94 = vsyncpa [#allocation3], 1 }
  0x2a   :  { %95 = vsyncpa [#allocation4], 1 }
  0x2b   :  { %96 = vsyncpa [#allocation5], 1 }

</bundles_post_ra>
